<compile_context>
chip_gen: v7x
topology: tpu7x:2x2x1
jax: 0.10.0
libtpu: 0.0.40
codegen_flags: <defaults>
</compile_context>

<pallas_src>
import jax
import jax.numpy as jnp
from jax import lax
from jax.experimental import pallas as pl
from jax.experimental.pallas import tpu as pltpu

EPS = 1e-8


def _cosine_sim_kernel(x1_ref, x2t_ref, inv1_ref, inv2_ref, o_ref):
    # Plain NN MXU matmul (x2 was transposed once in the wrapper), f32 accumulation.
    sim = jnp.dot(x1_ref[...], x2t_ref[...], preferred_element_type=jnp.float32)
    # Hoisted-norm scaling of the output tile; the *0.5 of (sim+1)/2 is folded into inv1.
    o_ref[...] = (sim * inv1_ref[...] * inv2_ref[...] + 0.5).astype(o_ref.dtype)


def _vmem_capacity_bytes() -> int:
    try:
        cap = getattr(pltpu.get_tpu_info(), "vmem_capacity_bytes", None)
        if cap:
            return int(cap)
    except Exception:
        pass
    return 64 * 1024 * 1024  # assume smallest per-core VMEM (v7x) if query fails


def cosine_similarity_matrix(
    x1: jax.Array,
    x2: jax.Array,
    *,
    tm: int = 256,
    tn: int = 256,
    use_bf16_matmul: bool = True,
    operand_scaling: bool = False,
    eps: float = EPS,
) -> jax.Array:
    """Pallas implementation of CosineSimilarityMatrix.forward (dim=1, eps=1e-8)."""
    n1, d = x1.shape
    n2, d2 = x2.shape
    assert d == d2, "feature dims must match"

    x1f = x1.astype(jnp.float32)
    x2f = x2.astype(jnp.float32)

    # Hoisted row norms (computed once, not per output tile):
    #   1 / max(||x||, eps) == rsqrt(max(sum(x^2), eps^2)).
    inv1 = lax.rsqrt(jnp.maximum(jnp.sum(x1f * x1f, axis=1, keepdims=True), eps * eps))
    inv2 = lax.rsqrt(jnp.maximum(jnp.sum(x2f * x2f, axis=1, keepdims=True), eps * eps))

    mxu_dtype = jnp.bfloat16 if use_bf16_matmul else jnp.float32

    if operand_scaling:
        # Fallback for extreme-magnitude rows (||x|| ~ 1e19) where the raw dot product
        # could overflow f32: normalize the operands instead; trivial output scales.
        x1_mxu = (x1f * inv1).astype(mxu_dtype)
        x2t_mxu = (x2f * inv2).astype(mxu_dtype).T
        inv1_arg = jnp.full((n1, 1), 0.5, jnp.float32)
        inv2_arg = jnp.ones((1, n2), jnp.float32)
    else:
        x1_mxu = x1f.astype(mxu_dtype)
        x2t_mxu = x2f.astype(mxu_dtype).T              # (D, N2): one-time layout plumbing
        inv1_arg = 0.5 * inv1                          # (N1, 1) — folds the /2
        inv2_arg = inv2.reshape(1, n2)                 # (1, N2)

    # ---- tiling --------------------------------------------------------------------
    in_bytes = 2 if use_bf16_matmul else 4
    row_align = 16 if use_bf16_matmul else 8           # bf16 packs 2 rows per sublane

    # Full-extent blocks are always legal regardless of alignment.
    tm = n1 if n1 <= tm else max(row_align, (tm // row_align) * row_align)
    tn = n2 if n2 <= tn else max(128, (tn // 128) * 128)

    def vmem_est(tm_, tn_):
        # Double-buffered x1 / x2t / out blocks + (layout-padded) scale vectors.
        x1_b = tm_ * d * in_bytes
        x2_b = d * tn_ * in_bytes
        o_b = tm_ * tn_ * 4
        inv_b = (max(tm_, 8) * 128 + 8 * max(tn_, 128)) * 4
        return 2 * (x1_b + x2_b + o_b + inv_b)

    vmem_cap = _vmem_capacity_bytes()
    budget = int(vmem_cap * 0.6)  # headroom for compiler scratch / semaphores

    # Keep all of x2 resident when it fits (single j block): x1 and x2 are then each
    # read from HBM exactly once (biggest win on v5e's narrow HBM).
    if n2 > tn and vmem_est(tm, n2) <= budget:
        tn = n2
    # Grow tm (<=512) while it fits: amortizes per-step overhead and halves how many
    # times x2 is re-streamed when it is not resident.
    while n1 >= 2 * tm and 2 * tm <= 512 and vmem_est(2 * tm, tn) <= budget:
        tm *= 2
    # Shrink if the requested tiles do not fit (large D).
    while vmem_est(tm, tn) > budget and tn > 128 and n2 > 128:
        tn = max(128, ((tn // 2) // 128) * 128)
    while vmem_est(tm, tn) > budget and tm > row_align and n1 > row_align:
        tm = max(row_align, ((tm // 2) // row_align) * row_align)

    vmem_limit = min(
        max(32 * 1024 * 1024, int(vmem_est(tm, tn) * 1.3) + (2 << 20)),
        int(vmem_cap * 0.85),
    )

    grid = (pl.cdiv(n1, tm), pl.cdiv(n2, tn))  # j innermost -> x1/inv1 tiles reused

    out = pl.pallas_call(
        _cosine_sim_kernel,
        out_shape=jax.ShapeDtypeStruct((n1, n2), jnp.float32),
        grid=grid,
        in_specs=[
            pl.BlockSpec((tm, d), lambda i, j: (i, 0)),    # x1 tile (resident over j)
            pl.BlockSpec((d, tn), lambda i, j: (0, j)),    # x2^T tile
            pl.BlockSpec((tm, 1), lambda i, j: (i, 0)),    # 0.5 / ||x1 row||
            pl.BlockSpec((1, tn), lambda i, j: (0, j)),    # 1 / ||x2 row||
        ],
        out_specs=pl.BlockSpec((tm, tn), lambda i, j: (i, j)),
        compiler_params=pltpu.CompilerParams(
            dimension_semantics=("parallel", "parallel"),
            vmem_limit_bytes=vmem_limit,
        ),
    )(x1_mxu, x2t_mxu, inv1_arg, inv2_arg)

    return out


def _reference(x1, x2, eps=EPS):
    # Pure-JAX reference mirroring the PyTorch code.
    xn1 = jnp.linalg.norm(x1, axis=1)
    xn2 = jnp.linalg.norm(x2, axis=1)
    x1n = x1 / jnp.maximum(xn1, eps)[:, None]
    x2n = x2 / jnp.maximum(xn2, eps)[:, None]
    return (x1n @ x2n.T + 1.0) / 2.0


if __name__ == "__main__":
    key = jax.random.PRNGKey(0)
    k1, k2 = jax.random.split(key)
    N1, N2, D = 8, 16, 32
    x1 = jax.random.normal(k1, (N1, D), dtype=jnp.float32)
    x2 = jax.random.normal(k2, (N2, D), dtype=jnp.float32)

    ref = _reference(x1, x2)

    # Exact (f32 MXU) path: tight tolerance.
    out_f32 = cosine_similarity_matrix(x1, x2, use_bf16_matmul=False)
    jax.block_until_ready(out_f32)
    assert out_f32.shape == (N1, N2)
    assert jnp.allclose(out_f32, ref, atol=1e-4, rtol=1e-4), float(
        jnp.max(jnp.abs(out_f32 - ref))
    )

    # Default fast path (bf16 MXU operands, f32 accumulation): loosened tolerance.
    out_bf16 = cosine_similarity_matrix(x1, x2)
    jax.block_until_ready(out_bf16)
    assert out_bf16.shape == (N1, N2)
    assert jnp.allclose(out_bf16, ref, atol=2e-2, rtol=2e-2), float(
        jnp.max(jnp.abs(out_bf16 - ref))
    )

    print("KERNEL_OK")
</pallas_src>

<mosaic_0001>
module attributes {stable_mosaic.version = 11 : i64} {
  func.func @_cosine_sim_kernel(%arg0: i32, %arg1: i32, %arg2: memref<8x32xf32, #tpu.memory_space<vmem>>, %arg3: memref<32x16xf32, #tpu.memory_space<vmem>>, %arg4: memref<8x1xf32, #tpu.memory_space<vmem>>, %arg5: memref<1x16xf32, #tpu.memory_space<vmem>>, %arg6: memref<8x16xf32, #tpu.memory_space<vmem>>) attributes {dimension_semantics = [#tpu.dimension_semantics<parallel>, #tpu.dimension_semantics<parallel>], iteration_bounds = array<i64: 1, 1>, scalar_prefetch = 0 : i64, scratch_operands = 0 : i64, tpu.core_type = #tpu.core_type<tc>, window_params = [{transform_indices = @transform_0, window_bounds = array<i64: 8, 32>}, {transform_indices = @transform_1, window_bounds = array<i64: 32, 16>}, {transform_indices = @transform_2, window_bounds = array<i64: 8, 1>}, {transform_indices = @transform_3, window_bounds = array<i64: 1, 16>}, {transform_indices = @transform_4, window_bounds = array<i64: 8, 16>}]} {
    %c0 = arith.constant 0 : index
    %c0_0 = arith.constant 0 : index
    %0 = vector.load %arg2[%c0, %c0_0] : memref<8x32xf32, #tpu.memory_space<vmem>>, vector<8x32xf32>
    %c0_1 = arith.constant 0 : index
    %c0_2 = arith.constant 0 : index
    %1 = vector.load %arg3[%c0_1, %c0_2] : memref<32x16xf32, #tpu.memory_space<vmem>>, vector<32x16xf32>
    %cst = arith.constant dense<0.000000e+00> : vector<8x16xf32>
    %2 = tpu.matmul %0, %1, %cst {dimension_numbers = #tpu.dot_dimension_numbers<[1], [0], [0], [1], [0, 0, 1, 1], [], []>} : vector<8x32xf32>, vector<32x16xf32>, vector<8x16xf32> -> vector<8x16xf32>
    %c0_3 = arith.constant 0 : index
    %c0_4 = arith.constant 0 : index
    %3 = vector.load %arg4[%c0_3, %c0_4] : memref<8x1xf32, #tpu.memory_space<vmem>>, vector<8x1xf32>
    %4 = vector.broadcast %3 : vector<8x1xf32> to vector<8x16xf32>
    %5 = arith.mulf %2, %4 : vector<8x16xf32>
    %c0_5 = arith.constant 0 : index
    %c0_6 = arith.constant 0 : index
    %6 = vector.load %arg5[%c0_5, %c0_6] : memref<1x16xf32, #tpu.memory_space<vmem>>, vector<1x16xf32>
    %7 = vector.broadcast %6 : vector<1x16xf32> to vector<8x16xf32>
    %8 = arith.mulf %5, %7 : vector<8x16xf32>
    %cst_7 = arith.constant 5.000000e-01 : f32
    %9 = vector.broadcast %cst_7 : f32 to vector<8x16xf32>
    %10 = arith.addf %8, %9 : vector<8x16xf32>
    %c0_8 = arith.constant 0 : index
    %c0_9 = arith.constant 0 : index
    %11 = vector.load %arg6[%c0_8, %c0_9] : memref<8x16xf32, #tpu.memory_space<vmem>>, vector<8x16xf32>
    tpu.vector_store %arg6[%c0_8, %c0_9], %10 {strides = array<i32>} : memref<8x16xf32, #tpu.memory_space<vmem>>, vector<8x16xf32>,
    return
  }
  func.func @transform_0(%arg0: i32, %arg1: i32) -> (i32, i32) {
    %c0_i32 = arith.constant 0 : i32
    %c0_i32_0 = arith.constant 0 : i32
    return %arg0, %c0_i32 : i32, i32
  }
  func.func @transform_1(%arg0: i32, %arg1: i32) -> (i32, i32) {
    %c0_i32 = arith.constant 0 : i32
    %c0_i32_0 = arith.constant 0 : i32
    return %c0_i32, %arg1 : i32, i32
  }
  func.func @transform_2(%arg0: i32, %arg1: i32) -> (i32, i32) {
    %c0_i32 = arith.constant 0 : i32
    %c0_i32_0 = arith.constant 0 : i32
    return %arg0, %c0_i32 : i32, i32
  }
  func.func @transform_3(%arg0: i32, %arg1: i32) -> (i32, i32) {
    %c0_i32 = arith.constant 0 : i32
    %c0_i32_0 = arith.constant 0 : i32
    return %c0_i32, %arg1 : i32, i32
  }
  func.func @transform_4(%arg0: i32, %arg1: i32) -> (i32, i32) {
    %c0_i32 = arith.constant 0 : i32
    return %arg0, %arg1 : i32, i32
  }
}

</mosaic_0001>

<bundles_post_ra>
// kernel: tpu_custom_call.1
= control target key start
LH: loop header
LB: loop body
LE: loop exit
PB: predicated region body
PF: predicated region fallthrough
CT: control target
= control target key end

     0   :  { %v183_v3 = vmov 0.0|0.0   ;;  %vm184_vm0 = vmmov 0   ;;  %v185_v6 = vmov 0.0   ;;  %v186_v8 = vmov 0   ;;  %s246_s0 = inlined_call_operand.vmem [shape: f32[8,32], index: 0, kind: input, shape index: {}]   ;;  %s247_s1 = inlined_call_operand.vmem [shape: f32[32,16], index: 1, kind: input, shape index: {}]   ;;  %s248_s2 = inlined_call_operand.vmem [shape: f32[8,1], index: 2, kind: input, shape index: {}]   ;;  %s249_s3 = inlined_call_operand.vmem [shape: f32[1,16], index: 3, kind: input, shape index: {}]   ;;  %s250_s4 = inlined_call_operand.hbm [shape: f32[8,16], index: 4, kind: output, shape index: {}]  }
   0x1   :  { %v19_v0 = vld [vmem:[%s247_s1] sm:$0xff]  ;;  %v20_v1 = vld [vmem:[%s247_s1 + $0x8] sm:$0xff]  ;;  %v21_v2 = vld [vmem:[%s247_s1 + $0x10] sm:$0xff]  ;;  %147 = vmatprep.subr.bf16.mxu0 %v183_v3  ;;  %144 = vmatprep.mubr.msk.f32.mxu0 %vm184_vm0, %v185_v6 }
   0x2   :  { %v148_v4 = vpack.c.bf16 %v20_v1, %v19_v0  ;;  %v22_v5 = vld [vmem:[%s247_s1 + $0x18] sm:$0xff]  ;;  %v97_v7 = vld [vmem:[%s248_s2] sm:$0xff]  ;;  %158 = vset.pattern.permute.xlu0 %v186_v8 }
   0x3   :  { %9 = vsyncpa [#allocation3], 0  ;;  %v151_v9 = vpack.c.bf16 %v22_v5, %v21_v2  ;;  %100 = vperm.xlu0 %158, %v97_v7   ;;  %v18_v10 = vld [vmem:[%s246_s0] sm:$0xff]  ;;  %vm23_vm1 = vcmask 261120   ;;  %s187_s2 = smov [#allocation2]   ;;  %vm113_vm2 = vcmask 130048  }
   0x4   :  { %149 = vmatpush3.bf16.msra.mxu0 %v148_v4  ;;  %v130_v13 = vld [vmem:[%s249_s3] ss:$0 sm:$0xff]  ;;  %s121_s28 = sshll.u32 %s187_s2, 4  ;;  %s122_s28 = int_to_ptr.vmem [resolvable:$true] %s121_s28 }
   0x5   :  { %150 = vmatprep.subr.bf16.mxu0 %v183_v3  ;;  %s159_s29 = scalar_lea.vmem %s122_s28, 128  ;;  %p164_p1 = scmp.lt.s32.totalorder %s122_s28, %s122_s28 }
   0x6   :  { %p160_p0 = scmp.ne.s32.totalorder %s122_s28, %s159_s29  ;;  %p165_p2 = scmp.lt.s32.totalorder %s159_s29, %s159_s29 }
   0x8   :  { %152 = vmatpush3.bf16.msra.mxu0 %v151_v9  ;;  %p166_p3 = por %p165_p2, %p164_p1 }
   0xa   :  { %p167_p4 = pnand %p166_p3, %p160_p0 }
   0xb   :  { %145 = vmatmul.mubr.msk.f32.vlgmr.msra.gmra.mrb[0].mxu0 %vm23_vm1, %v18_v10 }
  0x82   :  { %v101_v11 = vpop.permute.xlu0 %100 }
  0xde   :  { %v93_v12 = vpop.f32.mrb[0].mxu0 }
  0xdf   :  { %v103_v14 = vmul.f32 %v101_v11, %v93_v12  ;;  %v146_v15 = vpop.f32.mrb[1].mxu0 }
  0xe1   :  { %v111_v16 = vmul.f32 %v130_v13, %v103_v14 }
  0xe3   :  { %v112_v17 = vadd.f32 0.5, %v111_v16 }
  0xe5   :  { %114 = vst.msk [vmem:[#allocation2] sm:$0xff] %vm113_vm2, %v112_v17 }
  0xe6   :  { %170 = shalt.err (!%p167_p4)
}
  0xe7   :  { %s171_s3 = scalar_lea.hbm %s250_s4, 128 }
  0xe8   :  { %p172_p5 = scmp.ne.s32.totalorder %s250_s4, %s171_s3  ;;  %p175_p6 = scmp.lt.u32.totalorder %s171_s3, %s250_s4 }
  0xea   :  { %p177_p7 = pnand %p175_p6, %p172_p5 }
  0xec   :  { %180 = shalt.err (!%p177_p7)
}
  0xed   :  { %124 = dma.vmem_to_hbm [thread:$0]  %s122_s28, 128, %s250_s4, [#allocation3]  }
  0xee   :  { %181 = dma.done.wait [#allocation3], 128  }
  0xef   :  { %182 = vsyncadd [#allocation3], 4294967168 }
  0xf0   :  { %128 = vsyncpa [#allocation3], 1 }

</bundles_post_ra>
